<compile_context>
chip_gen: v5e
topology: v5e:2x2
jax: 0.10.0
libtpu: 0.0.40
codegen_flags: <defaults>
</compile_context>

<pallas_src>
import functools

import jax
import jax.numpy as jnp
from jax import lax
from jax.experimental import pallas as pl
from jax.experimental.pallas import tpu as pltpu


def _round_up(x, m):
    return (x + m - 1) // m * m


# ----------------------------------------------------------------------------
# Kernel 1: one LSTM layer, both directions (grid axis 0 = direction).
# ----------------------------------------------------------------------------
def _lstm_layer_kernel(x_ref, wih_ref, whh_ref, b_ref, y_ref,
                       xproj_sc, y_sc, h_sc, c_sc):
    """Shapes (Hp = hidden padded to x128, Bp = batch padded to x8, rows = t*Bp + b):

      x_ref   : (G, T*Bp, F)    layer input; G feature groups (1 for the raw input,
                                num_dirs for deeper layers), bf16
      wih_ref : (G, F, 4*Hp)    this direction's input->gate weights, bf16
      whh_ref : (Hp, 4*Hp)      this direction's recurrent weights, bf16
      b_ref   : (1, 4*Hp)       b_ih + b_hh (gate blocks zero padded), f32
      y_ref   : (T*Bp, Hp)      this direction's per-timestep hidden states, bf16
      xproj_sc: (T*Bp, 4*Hp)    f32 scratch (hoisted input projection)
      y_sc    : (T*Bp, Hp)      f32 scratch (per-step hidden states, aligned stores)
      h_sc/c_sc: (Bp, Hp)       f32 scratch (recurrent state)
    """
    d = pl.program_id(0)                      # 0 = forward, 1 = backward
    G = x_ref.shape[0]
    Hp = whh_ref.shape[0]
    Bp = h_sc.shape[0]
    TB = y_sc.shape[0]
    T = TB // Bp

    # --- Hoisted input projection: one MXU matmul with M = T*Bp, bias added once ---
    proj = jnp.dot(x_ref[0], wih_ref[0], preferred_element_type=jnp.float32)
    for g in range(1, G):                     # static (<= num_dirs) groups
        proj = proj + jnp.dot(x_ref[g], wih_ref[g],
                              preferred_element_type=jnp.float32)
    xproj_sc[...] = proj + b_ref[...]         # (T*Bp, 4*Hp) f32

    h_sc[...] = jnp.zeros_like(h_sc)
    c_sc[...] = jnp.zeros_like(c_sc)

    def step(i, carry):
        # Forward walks t = 0..T-1, backward walks t = T-1..0 (no flips in HBM).
        t = jnp.where(d == 0, i, T - 1 - i)
        row = pl.multiple_of(t * Bp, 8)       # Bp % 8 == 0 -> sublane-aligned slices
        gates = xproj_sc[pl.ds(row, Bp), :] + jnp.dot(
            h_sc[...].astype(jnp.bfloat16), whh_ref[...],
            preferred_element_type=jnp.float32)              # (Bp, 4*Hp) f32
        # Lane-aligned gate slices (Hp is a multiple of 128). PyTorch order i,f,g,o.
        i_g = jax.nn.sigmoid(gates[:, 0 * Hp:1 * Hp])
        f_g = jax.nn.sigmoid(gates[:, 1 * Hp:2 * Hp])
        g_g = jnp.tanh(gates[:, 2 * Hp:3 * Hp])
        o_g = jax.nn.sigmoid(gates[:, 3 * Hp:4 * Hp])
        c_new = f_g * c_sc[...] + i_g * g_g
        h_new = o_g * jnp.tanh(c_new)
        c_sc[...] = c_new
        h_sc[...] = h_new
        y_sc[pl.ds(row, Bp), :] = h_new       # aligned f32 (8,128) tile store
        return carry

    lax.fori_loop(0, T, step, 0)

    # Single bulk, lane-dense bf16 writeback of the whole layer output.
    y_ref[...] = y_sc[...].astype(y_ref.dtype)


# ----------------------------------------------------------------------------
# Kernel 2: fused ReLU -> Linear -> Softmax head (lane-dense, padded classes).
# ----------------------------------------------------------------------------
def _fc_head_kernel(y_ref, w_ref, b_ref, out_ref, *, n_valid):
    """y_ref  : (D, T*Bp, Hp)   bf16 LSTM output (native layout, no relayout)
       w_ref  : (D, T, Hp, Cp)  bf16 fc.weight.T regrouped per (dir, t), zero padded
       b_ref  : (1, Cp)         f32
       out_ref: (Bp, Cp)        f32 softmax probabilities (cols >= n_valid are 0)
    """
    D = y_ref.shape[0]
    T = w_ref.shape[1]
    Bp = out_ref.shape[0]
    Cp = out_ref.shape[1]

    y_act = jnp.maximum(y_ref[...], 0)        # ReLU once, stays bf16 (exact)
    acc = jnp.zeros((Bp, Cp), jnp.float32)
    for dr in range(D):                       # static, <= 2
        for t in range(T):                    # static
            acc = acc + jnp.dot(y_act[dr, t * Bp:(t + 1) * Bp, :],
                                w_ref[dr, t, :, :],
                                preferred_element_type=jnp.float32)
    logits = acc + b_ref[...]

    # Mask padded class lanes, then numerically-stable softmax.
    col = lax.broadcasted_iota(jnp.int32, (Bp, Cp), 1)
    logits = jnp.where(col < n_valid, logits, jnp.float32(-1e30))
    m = jnp.max(logits, axis=1, keepdims=True)
    e = jnp.exp(logits - m)
    denom = jnp.sum(e, axis=1, keepdims=True)
    out_ref[...] = e * pl.reciprocal(denom, approx=True)


# ----------------------------------------------------------------------------
# Wrappers
# ----------------------------------------------------------------------------
def lstm_bidir_layer(x_grp, wih, whh, b, *, batch):
    """x_grp: (G, T*Bp, F) bf16; wih: (D,G,F,4Hp); whh: (D,Hp,4Hp); b: (D,1,4Hp)."""
    D = wih.shape[0]
    G, TB, F = x_grp.shape
    Hp4 = wih.shape[-1]
    Hp = Hp4 // 4
    return pl.pallas_call(
        _lstm_layer_kernel,
        out_shape=jax.ShapeDtypeStruct((D, TB, Hp), jnp.bfloat16),
        grid=(D,),
        in_specs=[
            pl.BlockSpec((G, TB, F), lambda d: (0, 0, 0)),
            pl.BlockSpec((None, G, F, Hp4), lambda d: (d, 0, 0, 0)),
            pl.BlockSpec((None, Hp, Hp4), lambda d: (d, 0, 0)),
            pl.BlockSpec((None, 1, Hp4), lambda d: (d, 0, 0)),
        ],
        out_specs=pl.BlockSpec((None, TB, Hp), lambda d: (d, 0, 0)),
        scratch_shapes=[
            pltpu.VMEM((TB, Hp4), jnp.float32),   # hoisted input projection
            pltpu.VMEM((TB, Hp), jnp.float32),    # per-step hidden states
            pltpu.VMEM((batch, Hp), jnp.float32),
            pltpu.VMEM((batch, Hp), jnp.float32),
        ],
        compiler_params=pltpu.CompilerParams(
            dimension_semantics=("parallel",),          # v7x: one TC per direction
            vmem_limit_bytes=32 * 1024 * 1024,
        ),
    )(x_grp, wih, whh, b)


def fc_head(y, w4, b_pad, *, batch, n_classes):
    Cp = w4.shape[-1]
    out = pl.pallas_call(
        functools.partial(_fc_head_kernel, n_valid=n_classes),
        out_shape=jax.ShapeDtypeStruct((batch, Cp), jnp.float32),
        in_specs=[pl.BlockSpec(memory_space=pltpu.MemorySpace.VMEM)] * 3,
        out_specs=pl.BlockSpec(memory_space=pltpu.MemorySpace.VMEM),
        compiler_params=pltpu.CompilerParams(vmem_limit_bytes=32 * 1024 * 1024),
    )(y, w4, b_pad)
    return out[:, :n_classes]


def lstm_net_forward(x, packed, *, n_classes):
    """Forward pass matching LSTMNet.forward (h_0 = c_0 = 0)."""
    B, T, In = x.shape
    Bp = _round_up(B, 8)                       # sublane-aligned batch
    # Time-major 2-D rows (row = t*Bp + b); single feature group for the raw input.
    x_tm = jnp.transpose(x, (1, 0, 2))         # (T, B, In)
    x_tm = jnp.pad(x_tm, ((0, 0), (0, Bp - B), (0, 0)))
    layer_in = x_tm.reshape(1, T * Bp, In).astype(jnp.bfloat16)
    for (wih, whh, b) in packed["lstm"]:
        layer_in = lstm_bidir_layer(layer_in, wih, whh, b, batch=Bp)
    w4, bfc = packed["fc"]
    out = fc_head(layer_in, w4, bfc, batch=Bp, n_classes=n_classes)
    return out[:B]


# ----------------------------------------------------------------------------
# Parameter packing: PyTorch-layout params -> padded/stacked kernel layout.
# ----------------------------------------------------------------------------
def pack_params(params, *, input_size, hidden_size, num_layers, bidirectional,
                seq_length, n_classes):
    D = 2 if bidirectional else 1
    H = hidden_size
    Hp = _round_up(H, 128)
    Cp = _round_up(n_classes, 128)
    packed = {"lstm": []}
    for l in range(num_layers):
        in_groups = 1 if l == 0 else D
        in_feat = input_size if l == 0 else H
        Fp = in_feat if l == 0 else Hp
        wihs, whhs, bs = [], [], []
        for d in range(D):
            w_ih, w_hh, b_ih, b_hh = params["lstm"][(l, d)]
            wiht = w_ih.T.reshape(in_groups, in_feat, 4, H)
            wiht = jnp.pad(wiht, ((0, 0), (0, Fp - in_feat), (0, 0), (0, Hp - H)))
            wihs.append(wiht.reshape(in_groups, Fp, 4 * Hp))
            whht = w_hh.T.reshape(H, 4, H)
            whht = jnp.pad(whht, ((0, Hp - H), (0, 0), (0, Hp - H)))
            whhs.append(whht.reshape(Hp, 4 * Hp))
            bb = (b_ih + b_hh).reshape(4, H)
            bs.append(jnp.pad(bb, ((0, 0), (0, Hp - H))).reshape(1, 4 * Hp))
        packed["lstm"].append((
            jnp.stack(wihs).astype(jnp.bfloat16),   # (D, G, Fp, 4Hp)
            jnp.stack(whhs).astype(jnp.bfloat16),   # (D, Hp, 4Hp)
            jnp.stack(bs).astype(jnp.float32),      # (D, 1, 4Hp)
        ))
    w_fc, b_fc = params["fc"]                       # (C, T*D*H), (C,)
    w = w_fc.T.reshape(seq_length, D, H, n_classes)
    w = jnp.transpose(w, (1, 0, 2, 3))              # (D, T, H, C)
    w = jnp.pad(w, ((0, 0), (0, 0), (0, Hp - H), (0, Cp - n_classes)))
    packed["fc"] = (
        w.astype(jnp.bfloat16),                                           # (D,T,Hp,Cp)
        jnp.pad(b_fc, (0, Cp - n_classes)).reshape(1, Cp).astype(jnp.float32),
    )
    return packed


# ----------------------------------------------------------------------------
# Pure-JAX f32 reference (module semantics) for the correctness check.
# ----------------------------------------------------------------------------
def _ref_lstm_dir(x_tm, w_ih, w_hh, b_ih, b_hh, H):
    B = x_tm.shape[1]

    def step(carry, x_t):
        h, c = carry
        gates = x_t @ w_ih.T + h @ w_hh.T + b_ih + b_hh
        i_g = jax.nn.sigmoid(gates[:, 0 * H:1 * H])
        f_g = jax.nn.sigmoid(gates[:, 1 * H:2 * H])
        g_g = jnp.tanh(gates[:, 2 * H:3 * H])
        o_g = jax.nn.sigmoid(gates[:, 3 * H:4 * H])
        c = f_g * c + i_g * g_g
        h = o_g * jnp.tanh(c)
        return (h, c), h

    h0 = jnp.zeros((B, H), jnp.float32)
    c0 = jnp.zeros((B, H), jnp.float32)
    _, ys = lax.scan(step, (h0, c0), x_tm)
    return ys


def ref_forward(x, params, *, hidden_size, num_layers, bidirectional):
    B, T, _ = x.shape
    num_dirs = 2 if bidirectional else 1
    layer_in = jnp.transpose(x, (1, 0, 2))
    for l in range(num_layers):
        outs = []
        for d in range(num_dirs):
            w_ih, w_hh, b_ih, b_hh = params["lstm"][(l, d)]
            xin = jnp.flip(layer_in, axis=0) if d == 1 else layer_in
            y = _ref_lstm_dir(xin, w_ih, w_hh, b_ih, b_hh, hidden_size)
            if d == 1:
                y = jnp.flip(y, axis=0)
            outs.append(y)
        layer_in = jnp.concatenate(outs, axis=-1)
    hi = jnp.transpose(layer_in, (1, 0, 2)).reshape(B, -1)
    hi = jnp.maximum(hi, 0.0)
    w_fc, b_fc = params["fc"]
    logits = hi @ w_fc.T + b_fc
    return jax.nn.softmax(logits, axis=1)


# ----------------------------------------------------------------------------
# Deterministic PyTorch-style init (uniform(-1/sqrt(H), 1/sqrt(H))).
# ----------------------------------------------------------------------------
def init_params(key, *, n_classes, input_size, hidden_size, num_layers,
                bidirectional, seq_length):
    num_dirs = 2 if bidirectional else 1
    k = 1.0 / jnp.sqrt(hidden_size)
    params = {"lstm": {}}
    for l in range(num_layers):
        in_size = input_size if l == 0 else num_dirs * hidden_size
        for d in range(num_dirs):
            key, k1, k2, k3, k4 = jax.random.split(key, 5)
            w_ih = jax.random.uniform(k1, (4 * hidden_size, in_size), jnp.float32, -k, k)
            w_hh = jax.random.uniform(k2, (4 * hidden_size, hidden_size), jnp.float32, -k, k)
            b_ih = jax.random.uniform(k3, (4 * hidden_size,), jnp.float32, -k, k)
            b_hh = jax.random.uniform(k4, (4 * hidden_size,), jnp.float32, -k, k)
            params["lstm"][(l, d)] = (w_ih, w_hh, b_ih, b_hh)
    fc_in = num_dirs * hidden_size * seq_length
    kf = 1.0 / jnp.sqrt(fc_in)
    key, k1, k2 = jax.random.split(key, 3)
    w_fc = jax.random.uniform(k1, (n_classes, fc_in), jnp.float32, -kf, kf)
    b_fc = jax.random.uniform(k2, (n_classes,), jnp.float32, -kf, kf)
    params["fc"] = (w_fc, b_fc)
    return params


# ----------------------------------------------------------------------------
if __name__ == "__main__":
    B, T = 2, 8
    INPUT_SIZE = 16
    HIDDEN = 32
    NUM_LAYERS = 2
    BIDIRECTIONAL = True
    N_CLASSES = 10

    key = jax.random.PRNGKey(0)
    key, kx, kp = jax.random.split(key, 3)
    x = jax.random.normal(kx, (B, T, INPUT_SIZE), jnp.float32)
    params = init_params(
        kp, n_classes=N_CLASSES, input_size=INPUT_SIZE, hidden_size=HIDDEN,
        num_layers=NUM_LAYERS, bidirectional=BIDIRECTIONAL, seq_length=T,
    )
    packed = pack_params(
        params, input_size=INPUT_SIZE, hidden_size=HIDDEN, num_layers=NUM_LAYERS,
        bidirectional=BIDIRECTIONAL, seq_length=T, n_classes=N_CLASSES,
    )

    out = lstm_net_forward(x, packed, n_classes=N_CLASSES)
    out = jax.block_until_ready(out)

    ref = ref_forward(x, params, hidden_size=HIDDEN, num_layers=NUM_LAYERS,
                      bidirectional=BIDIRECTIONAL)

    assert out.shape == (B, N_CLASSES)
    # bf16 matmuls + approximate reciprocal -> loosened tolerances vs the f32 ref.
    assert jnp.allclose(jnp.sum(out, axis=1), 1.0, atol=2e-2)
    assert jnp.allclose(out, ref, atol=2e-2, rtol=2e-2)

    print("KERNEL_OK")
</pallas_src>

<mosaic_0001>
module attributes {stable_mosaic.version = 11 : i64} {
  func.func @_lstm_layer_kernel(%arg0: i32, %arg1: memref<1x64x16xbf16, #tpu.memory_space<vmem>>, %arg2: memref<1x1x16x512xbf16, #tpu.memory_space<vmem>>, %arg3: memref<1x128x512xbf16, #tpu.memory_space<vmem>>, %arg4: memref<1x1x512xf32, #tpu.memory_space<vmem>>, %arg5: memref<1x64x128xbf16, #tpu.memory_space<vmem>>, %arg6: memref<64x512xf32, #tpu.memory_space<vmem>>, %arg7: memref<64x128xf32, #tpu.memory_space<vmem>>, %arg8: memref<8x128xf32, #tpu.memory_space<vmem>>, %arg9: memref<8x128xf32, #tpu.memory_space<vmem>>) attributes {dimension_semantics = [#tpu.dimension_semantics<parallel>], iteration_bounds = array<i64: 2>, scalar_prefetch = 0 : i64, scratch_operands = 4 : i64, tpu.core_type = #tpu.core_type<tc>, window_params = [{pipeline_mode = #tpu.pipeline_mode<synchronous>, transform_indices = @transform_0, window_bounds = array<i64: 1, 64, 16>}, {transform_indices = @transform_1, window_bounds = array<i64: 1, 1, 16, 512>}, {transform_indices = @transform_2, window_bounds = array<i64: 1, 128, 512>}, {transform_indices = @transform_3, window_bounds = array<i64: 1, 1, 512>}, {transform_indices = @transform_4, window_bounds = array<i64: 1, 64, 128>}]} {
    %c0 = arith.constant 0 : index
    %c0_0 = arith.constant 0 : index
    %c0_1 = arith.constant 0 : index
    %0 = vector.load %arg1[%c0, %c0_0, %c0_1] : memref<1x64x16xbf16, #tpu.memory_space<vmem>>, vector<1x64x16xbf16>
    %1 = vector.shape_cast %0 : vector<1x64x16xbf16> to vector<64x16xbf16>
    %c0_2 = arith.constant 0 : index
    %c0_3 = arith.constant 0 : index
    %c0_4 = arith.constant 0 : index
    %c0_5 = arith.constant 0 : index
    %2 = vector.load %arg2[%c0_2, %c0_3, %c0_4, %c0_5] : memref<1x1x16x512xbf16, #tpu.memory_space<vmem>>, vector<1x1x16x512xbf16>
    %3 = vector.shape_cast %2 : vector<1x1x16x512xbf16> to vector<16x512xbf16>
    %cst = arith.constant dense<0.000000e+00> : vector<64x512xf32>
    %4 = tpu.matmul %1, %3, %cst {dimension_numbers = #tpu.dot_dimension_numbers<[1], [0], [0], [1], [0, 0, 1, 1], [], []>} : vector<64x16xbf16>, vector<16x512xbf16>, vector<64x512xf32> -> vector<64x512xf32>
    %c0_6 = arith.constant 0 : index
    %c0_7 = arith.constant 0 : index
    %c0_8 = arith.constant 0 : index
    %5 = vector.load %arg4[%c0_6, %c0_7, %c0_8] : memref<1x1x512xf32, #tpu.memory_space<vmem>>, vector<1x1x512xf32>
    %6 = vector.shape_cast %5 : vector<1x1x512xf32> to vector<1x512xf32>
    %7 = vector.broadcast %6 : vector<1x512xf32> to vector<64x512xf32>
    %8 = arith.addf %4, %7 : vector<64x512xf32>
    %c0_9 = arith.constant 0 : index
    %c0_10 = arith.constant 0 : index
    %9 = vector.load %arg6[%c0_9, %c0_10] : memref<64x512xf32, #tpu.memory_space<vmem>>, vector<64x512xf32>
    tpu.vector_store %arg6[%c0_9, %c0_10], %8 {strides = array<i32>} : memref<64x512xf32, #tpu.memory_space<vmem>>, vector<64x512xf32>,
    %cst_11 = arith.constant 0.000000e+00 : f32
    %10 = vector.broadcast %cst_11 : f32 to vector<8x128xf32>
    %c0_12 = arith.constant 0 : index
    %c0_13 = arith.constant 0 : index
    %11 = vector.load %arg8[%c0_12, %c0_13] : memref<8x128xf32, #tpu.memory_space<vmem>>, vector<8x128xf32>
    tpu.vector_store %arg8[%c0_12, %c0_13], %10 {strides = array<i32>} : memref<8x128xf32, #tpu.memory_space<vmem>>, vector<8x128xf32>,
    %cst_14 = arith.constant 0.000000e+00 : f32
    %12 = vector.broadcast %cst_14 : f32 to vector<8x128xf32>
    %c0_15 = arith.constant 0 : index
    %c0_16 = arith.constant 0 : index
    %13 = vector.load %arg9[%c0_15, %c0_16] : memref<8x128xf32, #tpu.memory_space<vmem>>, vector<8x128xf32>
    tpu.vector_store %arg9[%c0_15, %c0_16], %12 {strides = array<i32>} : memref<8x128xf32, #tpu.memory_space<vmem>>, vector<8x128xf32>,
    %c0_i32 = arith.constant 0 : i32
    %c8_i32 = arith.constant 8 : i32
    %14 = arith.addi %c0_i32, %c8_i32 : i32
    %c1_i32 = arith.constant 1 : i32
    scf.for %arg10 = %c0_i32 to %14 step %c1_i32  : i32 {
      %c0_i32_23 = arith.constant 0 : i32
      %20 = arith.cmpi eq, %arg0, %c0_i32_23 : i32
      %c7_i32 = arith.constant 7 : i32
      %21 = arith.subi %c7_i32, %arg10 : i32
      %22 = arith.select %20, %arg10, %21 : i32
      %c8_i32_24 = arith.constant 8 : i32
      %23 = arith.muli %22, %c8_i32_24 : i32
      %24 = tpu.assume_multiple %23, 8 : i32
      %25 = arith.index_cast %24 : i32 to index
      %c0_25 = arith.constant 0 : index
      %26 = vector.load %arg6[%25, %c0_25] : memref<64x512xf32, #tpu.memory_space<vmem>>, vector<8x512xf32>
      %c0_26 = arith.constant 0 : index
      %c0_27 = arith.constant 0 : index
      %27 = vector.load %arg8[%c0_26, %c0_27] : memref<8x128xf32, #tpu.memory_space<vmem>>, vector<8x128xf32>
      %28 = arith.truncf %27 : vector<8x128xf32> to vector<8x128xbf16>
      %c0_28 = arith.constant 0 : index
      %c0_29 = arith.constant 0 : index
      %c0_30 = arith.constant 0 : index
      %29 = vector.load %arg3[%c0_28, %c0_29, %c0_30] : memref<1x128x512xbf16, #tpu.memory_space<vmem>>, vector<1x128x512xbf16>
      %30 = vector.shape_cast %29 : vector<1x128x512xbf16> to vector<128x512xbf16>
      %cst_31 = arith.constant dense<0.000000e+00> : vector<8x512xf32>
      %31 = tpu.matmul %28, %30, %cst_31 {dimension_numbers = #tpu.dot_dimension_numbers<[1], [0], [0], [1], [0, 0, 1, 1], [], []>} : vector<8x128xbf16>, vector<128x512xbf16>, vector<8x512xf32> -> vector<8x512xf32>
      %32 = arith.addf %26, %31 : vector<8x512xf32>
      %33 = vector.extract_strided_slice %32 {offsets = [0, 0], sizes = [8, 128], strides = [1, 1]} : vector<8x512xf32> to vector<8x128xf32>
      %34 = arith.negf %33 : vector<8x128xf32>
      %35 = math.exp %34 : vector<8x128xf32>
      %cst_32 = arith.constant 1.000000e+00 : f32
      %36 = vector.broadcast %cst_32 : f32 to vector<8x128xf32>
      %37 = arith.addf %36, %35 : vector<8x128xf32>
      %38 = arith.divf %36, %37 : vector<8x128xf32>
      %39 = vector.extract_strided_slice %32 {offsets = [0, 128], sizes = [8, 128], strides = [1, 1]} : vector<8x512xf32> to vector<8x128xf32>
      %40 = arith.negf %39 : vector<8x128xf32>
      %41 = math.exp %40 : vector<8x128xf32>
      %cst_33 = arith.constant 1.000000e+00 : f32
      %42 = vector.broadcast %cst_33 : f32 to vector<8x128xf32>
      %43 = arith.addf %42, %41 : vector<8x128xf32>
      %44 = arith.divf %42, %43 : vector<8x128xf32>
      %45 = vector.extract_strided_slice %32 {offsets = [0, 256], sizes = [8, 128], strides = [1, 1]} : vector<8x512xf32> to vector<8x128xf32>
      %46 = math.tanh %45 : vector<8x128xf32>
      %47 = vector.extract_strided_slice %32 {offsets = [0, 384], sizes = [8, 128], strides = [1, 1]} : vector<8x512xf32> to vector<8x128xf32>
      %48 = arith.negf %47 : vector<8x128xf32>
      %49 = math.exp %48 : vector<8x128xf32>
      %cst_34 = arith.constant 1.000000e+00 : f32
      %50 = vector.broadcast %cst_34 : f32 to vector<8x128xf32>
      %51 = arith.addf %50, %49 : vector<8x128xf32>
      %52 = arith.divf %50, %51 : vector<8x128xf32>
      %c0_35 = arith.constant 0 : index
      %c0_36 = arith.constant 0 : index
      %53 = vector.load %arg9[%c0_35, %c0_36] : memref<8x128xf32, #tpu.memory_space<vmem>>, vector<8x128xf32>
      %54 = arith.mulf %44, %53 : vector<8x128xf32>
      %55 = arith.mulf %38, %46 : vector<8x128xf32>
      %56 = arith.addf %54, %55 : vector<8x128xf32>
      %57 = math.tanh %56 : vector<8x128xf32>
      %58 = arith.mulf %52, %57 : vector<8x128xf32>
      %c0_37 = arith.constant 0 : index
      %c0_38 = arith.constant 0 : index
      %59 = vector.load %arg9[%c0_37, %c0_38] : memref<8x128xf32, #tpu.memory_space<vmem>>, vector<8x128xf32>
      tpu.vector_store %arg9[%c0_37, %c0_38], %56 {strides = array<i32>} : memref<8x128xf32, #tpu.memory_space<vmem>>, vector<8x128xf32>,
      %c0_39 = arith.constant 0 : index
      %c0_40 = arith.constant 0 : index
      %60 = vector.load %arg8[%c0_39, %c0_40] : memref<8x128xf32, #tpu.memory_space<vmem>>, vector<8x128xf32>
      tpu.vector_store %arg8[%c0_39, %c0_40], %58 {strides = array<i32>} : memref<8x128xf32, #tpu.memory_space<vmem>>, vector<8x128xf32>,
      %61 = arith.index_cast %24 : i32 to index
      %c0_41 = arith.constant 0 : index
      %62 = vector.load %arg7[%61, %c0_41] : memref<64x128xf32, #tpu.memory_space<vmem>>, vector<8x128xf32>
      tpu.vector_store %arg7[%61, %c0_41], %58 {strides = array<i32>} : memref<64x128xf32, #tpu.memory_space<vmem>>, vector<8x128xf32>,
    }
    %c8_i32_17 = arith.constant 8 : i32
    %c0_18 = arith.constant 0 : index
    %c0_19 = arith.constant 0 : index
    %15 = vector.load %arg7[%c0_18, %c0_19] : memref<64x128xf32, #tpu.memory_space<vmem>>, vector<64x128xf32>
    %16 = arith.truncf %15 : vector<64x128xf32> to vector<64x128xbf16>
    %c0_20 = arith.constant 0 : index
    %c0_21 = arith.constant 0 : index
    %c0_22 = arith.constant 0 : index
    %17 = vector.load %arg5[%c0_20, %c0_21, %c0_22] : memref<1x64x128xbf16, #tpu.memory_space<vmem>>, vector<1x64x128xbf16>
    %18 = vector.shape_cast %17 : vector<1x64x128xbf16> to vector<64x128xbf16>
    %19 = vector.shape_cast %16 : vector<64x128xbf16> to vector<1x64x128xbf16>
    tpu.vector_store %arg5[%c0_20, %c0_21, %c0_22], %19 {strides = array<i32>} : memref<1x64x128xbf16, #tpu.memory_space<vmem>>, vector<1x64x128xbf16>,
    return
  }
  func.func @transform_0(%arg0: i32) -> (i32, i32, i32) {
    %c0_i32 = arith.constant 0 : i32
    %c0_i32_0 = arith.constant 0 : i32
    %c0_i32_1 = arith.constant 0 : i32
    %c0_i32_2 = arith.constant 0 : i32
    return %c0_i32, %c0_i32_0, %c0_i32_1 : i32, i32, i32
  }
  func.func @transform_1(%arg0: i32) -> (i32, i32, i32, i32) {
    %c0_i32 = arith.constant 0 : i32
    %c0_i32_0 = arith.constant 0 : i32
    %c0_i32_1 = arith.constant 0 : i32
    %c0_i32_2 = arith.constant 0 : i32
    return %arg0, %c0_i32, %c0_i32_0, %c0_i32_1 : i32, i32, i32, i32
  }
  func.func @transform_2(%arg0: i32) -> (i32, i32, i32) {
    %c0_i32 = arith.constant 0 : i32
    %c0_i32_0 = arith.constant 0 : i32
    %c0_i32_1 = arith.constant 0 : i32
    return %arg0, %c0_i32, %c0_i32_0 : i32, i32, i32
  }
  func.func @transform_3(%arg0: i32) -> (i32, i32, i32) {
    %c0_i32 = arith.constant 0 : i32
    %c0_i32_0 = arith.constant 0 : i32
    %c0_i32_1 = arith.constant 0 : i32
    return %arg0, %c0_i32, %c0_i32_0 : i32, i32, i32
  }
  func.func @transform_4(%arg0: i32) -> (i32, i32, i32) {
    %c0_i32 = arith.constant 0 : i32
    %c0_i32_0 = arith.constant 0 : i32
    %c0_i32_1 = arith.constant 0 : i32
    return %arg0, %c0_i32, %c0_i32_0 : i32, i32, i32
  }
}

</mosaic_0001>

<bundles_post_ra>
// kernel: tpu_custom_call.1
= control target key start
LH: loop header
LB: loop body
LE: loop exit
PB: predicated region body
PF: predicated region fallthrough
CT: control target
= control target key end

     0   :  { %s1849_s0 = inlined_call_operand.vmem [shape: bf16[1,64,16], index: 0, kind: input, shape index: {}]   ;;  %s1850_s1 = inlined_call_operand.hbm [shape: bf16[2,1,16,512], index: 1, kind: input, shape index: {}]   ;;  %s1851_s2 = inlined_call_operand.hbm [shape: bf16[2,128,512], index: 2, kind: input, shape index: {}]   ;;  %s1852_s3 = inlined_call_operand.vmem [shape: f32[2,1,512], index: 3, kind: input, shape index: {}]   ;;  %s1853_s4 = inlined_call_operand.hbm [shape: bf16[2,64,128], index: 4, kind: output, shape index: {}]  }
   0x1   :  { %1856 = sst [smem:[#allocation17_spill]] %s1850_s1 }
   0x2   :  { %9 = vsyncpa [#allocation7], 0 }
   0x3   :  { %11 = vsyncpa [#allocation7 + $0x1], 0 }
   0x4   :  { %12 = vsyncpa [#allocation10], 0 }
   0x5   :  { %14 = vsyncpa [#allocation10 + $0x1], 0 }
   0x6   :  { %15 = vsyncpa [#allocation8], 0 }
   0x7   :  { %17 = vsyncpa [#allocation8 + $0x1], 0  ;;  %s1515_s15 = smov 0   ;;  %s1517_s16 = smov 0  }
   0x8   :  { %s1519_s17 = smov 0   ;;  %s1521_s18 = smov 0  }
   0x9 LB: > { %1857 = sst [smem:[#allocation15_spill]] %s1475_s17  ;;  %s1536_s19 = sadd.s32 4294967295, %s1479_s18   ;;  %s1479_s18 = sphi %s1521_s18, %s1872_s18   ;;  %s1475_s17 = sphi %s1519_s17, %s1869_s17   ;;  %s1471_s16 = sphi %s1517_s16, %s1871_s16   ;;  %s1467_s15 = sphi %s1515_s15, %s1870_s15  }
   0xa   : > { %s997_s20 = sadd.s32 4294967294, %s1479_s18   ;;  %s1540_s21 = sadd.s32 1, %s1479_s18  }
   0xb   : > { %s51_s22 = sadd.s32 1, %s1475_s17  ;;  %s48_s23 = ssub.s32 %s1479_s18, %s1540_s21 }
   0xc   : > { %p58_p0 = scmp.ne.s32.totalorder %s1475_s17, %s1471_s16  ;;  %p49_p1 = scmp.eq.s32.totalorder %s48_s23, 0 }
   0xd   : > { %p59_p2 = scmp.eq.s32.totalorder %s1479_s18, 0  ;;  %p64_p3 = scmp.ne.s32.totalorder %s1471_s16, %s1467_s15 }
   0xe   : > { %p1854_p4 = scmp.eq.s32.totalorder %s1536_s19, 0  ;;  %p140_p7 = scmp.eq.s32.totalorder %s1536_s19, 1 }
   0xf   : > { %s1552_s24 = scalar_select %p49_p1, %s1475_s17, %s51_s22  }
  0x10   : > { %p1554_p5 = por %p59_p2, %p58_p0  ;;  %p1560_p6 = por %p1854_p4, %p64_p3 }
  0x11   : > { %1858 = sst [smem:[#allocation16_spill]] %s1552_s24  ;;  %p146_p8 = scmp.eq.s32.totalorder %s997_s20, 1 }
  0x12   : > { %p1282_p10 = scmp.lt.s32.totalorder %s1479_s18, 2  ;;  %p1567_p11 = por %p140_p7, %p58_p0 }
  0x13   : > { %p1571_p12 = por %p146_p8, %p64_p3  ;;  %s1576_s29 = sand.u32 1, %s1475_s17  }
  0x14   : > { %s1198_s30 = sshll.u32 %s1479_s18, 5  ;;  %s1000_s5 = sshll.u32 %s1576_s29, 5 }
  0x15   : > { %s1863_s1 = sld [smem:[#allocation17_spill]]  ;;  %s173_s10 = scalar_lea.vmem [#allocation6], %s1000_s5 }
  0x16   : > { %s181_s11 = sshll.u32 %s173_s10, 4  ;;  %p1585_p13 = pnand %p1282_p10, %p1554_p5  ;;  %s182_s11 = int_to_ptr.vmem [resolvable:$true] %s181_s11 }
  0x17   : > { %p1006_p0 = scmp.ge.s32.totalorder %s1479_s18, 1  ;;  %p218_p1 = scmp.lt.s32.totalorder %s1479_s18, 3 }
  0x18   : > { %s170_s13 = scalar_lea.sflag [#allocation7], %s1576_s29  ;;  %p1349_p3 = pneg %p1585_p13 }
  0x1b   : > { %s178_s8 = scalar_lea.hbm %s1863_s1, %s1198_s30  ;;  %s1352_s25 = scalar_lea.hbm %s1863_s1, 64 }
  0x1c   : > { %s179_s9 = sshll.u32 %s178_s8, 4  ;;  %s180_s9 = int_to_ptr.hbm [resolvable:$true] %s179_s9 }
  0x1d   : > { %s1345_s14 = sshra.s32 %s180_s9, 4  ;;  %s1346_s14 = int_to_ptr.hbm [resolvable:$true] %s1345_s14 }
  0x1e   : > { %s1347_s20 = scalar_lea.hbm %s1346_s14, 32  ;;  %p1353_p5 = scmp.lt.s32.totalorder %s1346_s14, %s1863_s1 }
  0x1f   : > { %p1348_p2 = scmp.ne.s32.totalorder %s1346_s14, %s1347_s20  ;;  %p1354_p10 = scmp.lt.s32.totalorder %s1352_s25, %s1347_s20 }
  0x21   : > { %p1350_p7 = pnand %p1349_p3, %p1348_p2  ;;  %p1355_p9 = por %p1354_p10, %p1353_p5 }
  0x23   : > { %p1351_p8 = pneg %p1350_p7 }
  0x25   : > { %p1356_p4 = pnand %p1355_p9, %p1351_p8 }
  0x27   : > { %1359 = shalt.err (!%p1356_p4)
}
  0x28   : > { %s1485_s6 = smov 256   ;;  %s1486_s7 = smov 16  }
  0x29   : > { %1274 = dma.hbm_to_vmem [thread:$0]  (!%p1585_p13), %s180_s9, 512, %s182_s11, %s170_s13, %s1485_s6, %s1485_s6, %s1486_s7  }
  0x2a   : > { %p1609_p2 = pnand %p1006_p0, %p218_p1  ;;  %s1003_s10 = sshll.u32 %s1576_s29, 8 }
  0x2b   : > { %s1199_s14 = sshll.u32 %s1479_s18, 8  ;;  %s195_s30 = scalar_lea.vmem [#allocation9], %s1003_s10 }
  0x2c   : > { %s200_s23 = scalar_lea.hbm %s1851_s2, %s1199_s14  ;;  %s203_s5 = sshll.u32 %s195_s30, 4  ;;  %s204_s5 = int_to_ptr.vmem [resolvable:$true] %s203_s5 }
  0x2d   : > { %s201_s25 = sshll.u32 %s200_s23, 4  ;;  %s192_s1 = scalar_lea.sflag [#allocation10], %s1576_s29  ;;  %s202_s25 = int_to_ptr.hbm [resolvable:$true] %s201_s25 }
  0x2e   : > { %s1375_s24 = sshra.s32 %s202_s25, 4  ;;  %s1382_s17 = scalar_lea.hbm %s1851_s2, 512  ;;  %s1376_s24 = int_to_ptr.hbm [resolvable:$true] %s1375_s24 }
  0x2f   : > { %s1377_s9 = scalar_lea.hbm %s1376_s24, 256  ;;  %p1383_p1 = scmp.lt.s32.totalorder %s1376_s24, %s1851_s2 }
  0x30   : > { %p1378_p4 = scmp.ne.s32.totalorder %s1376_s24, %s1377_s9  ;;  %p1384_p7 = scmp.lt.s32.totalorder %s1382_s17, %s1377_s9 }
  0x32   : > { %p1380_p9 = pnand %p1378_p4, %p1349_p3  ;;  %p1385_p8 = por %p1384_p7, %p1383_p1 }
  0x34   : > { %p1381_p0 = pneg %p1380_p9 }
  0x36   : > { %p1386_p5 = pnand %p1385_p8, %p1381_p0 }
  0x38   : > { %1389 = shalt.err (!%p1386_p5)
}
  0x39   : > { %1277 = dma.hbm_to_vmem [thread:$0]  (!%p1585_p13), %s202_s25, 4096, %s204_s5, %s192_s1, %s1485_s6, %s1485_s6, %s1486_s7  }
  0x3a   : > { %222 = sbr.rel (%p1609_p2) target bundleno = 489 (0x1e9), region = 36  ;;  %s1633_s29 = sand.u32 (!%p1609_p2), 1, %s1471_s16  }
  0x3b   : > { %s1007_s10 = sshll.u32 (!%p1609_p2), %s1633_s29, 5  ;;  %s225_s22 = scalar_lea.sflag (!%p1609_p2), [#allocation7], %s1633_s29 }
  0x3c   : > { %s228_s17 = scalar_lea.vmem (!%p1609_p2), [#allocation6], %s1007_s10 }
  0x3f   : > { %1454 = dma.done.wait (%p1560_p6), %s225_s22, 512  }
  0x40   : > { %1456 = vsyncadd (%p1560_p6), %s225_s22, 4294966784  ;;  %s1008_s1 = sshll.u32 %s1633_s29, 8  ;;  %s235_s24 = scalar_lea.sflag [#allocation10], %s1633_s29 }
  0x41   : > { %s1645_s12 = scalar_lea.vmem [#allocation9], %s1008_s1 }
  0x42   : > { %1458 = dma.done.wait (%p1560_p6), %s235_s24, 4096  }
  0x43   : > { %1460 = vsyncadd (%p1560_p6), %s235_s24, 4294963200  ;;  %v1487_v0 = vmov 0.0   ;;  %v1029_v1 = vld [vmem:[%s228_s17] sm:$0xf]  ;;  %v1206_v2 = vld [vmem:[%s228_s17 + $0xc] sm:$0xf0] }
  0x44   : > { %501 = vst [vmem:[#allocation4] sm:$0xff] %v1487_v0  ;;  %v1204_v3 = vld [vmem:[%s228_s17 + $0x4] sm:$0xf]  ;;  %v1030_v4 = vor.u32 %v1206_v2, %v1029_v1  ;;  %v1031_v5 = vld [vmem:[%s228_s17 + $0x10] sm:$0xf0]  ;;  %vm340_vm0 = vcmask 130048  }
  0x45   : > { %502 = vst [vmem:[#allocation5] sm:$0xff] %v1487_v0  ;;  %v1037_v6 = vld [vmem:[%s228_s17 + $0x8] sm:$0xf]  ;;  %v1207_v7 = vld [vmem:[%s228_s17 + $0x14] sm:$0xf0]  ;;  %v1034_v8 = vor.u32 %v1204_v3, %v1031_v5  ;;  %v1200_v12 = vld [vmem:[%s1849_s0] sm:$0xff] }
  0x46   : > { %v1038_v9 = vor.u32 %v1207_v7, %v1037_v6  ;;  %v1205_v10 = vld [vmem:[%s228_s17 + $0xc] sm:$0xf]  ;;  %v1039_v11 = vld [vmem:[%s228_s17 + $0x18] sm:$0xf0]  ;;  %360 = vmatpush.bf16.msra.mxu0 %v1030_v4  ;;  %v1202_v15 = vld [vmem:[%s1849_s0 + $0x10] sm:$0xff]  ;;  %p273_p6 = scmp.lt.s32.totalorder %s1536_s19, 1 }
  0x47   : > { %v1042_v13 = vor.u32 %v1205_v10, %v1039_v11  ;;  %389 = vmatpush.bf16.msra.mxu1 %v1034_v8  ;;  %v1201_v14 = vld [vmem:[%s1849_s0 + $0x8] sm:$0xff]  ;;  %v1203_v16 = vld [vmem:[%s1849_s0 + $0x18] sm:$0xff]  ;;  %s1726_s22 = scalar_lea.vmem [#allocation11], %s1007_s10  ;;  %s1728_s17 = smov 0  }
  0x48   : > { %418 = vmatpush.bf16.msra.mxu2 %v1038_v9  ;;  %s274_s9 = scalar_select %p273_p6, %s1536_s19, 1 }
  0x49   : > { %447 = vmatpush.bf16.msra.mxu3 %v1042_v13  ;;  %1043 = vmatmul.msk.bf16.vlgmr.msra.gmra.mxu0 %vm340_vm0, %v1200_v12 }
  0x4a   : > { %1047 = vmatmul.msk.bf16.vlgmr.msra.gmra.mxu1 %vm340_vm0, %v1200_v12  ;;  %s1010_s11 = sshll.u32 %s274_s9, 2 }
  0x4b   : > { %1051 = vmatmul.msk.bf16.vlgmr.msra.gmra.mxu2 %vm340_vm0, %v1200_v12  ;;  %s276_s14 = scalar_lea.vmem %s1852_s3, %s1010_s11 }
  0x4c   : > { %1055 = vmatmul.msk.bf16.vlgmr.msra.gmra.mxu3 %vm340_vm0, %v1200_v12  ;;  %v290_v17 = vld [vmem:[%s276_s14] sm:$0xf] }
  0x4d   : > { %v1684_v18 = vperm.slane %v290_v17, 0  ;;  %v1686_v19 = vperm.slane %v290_v17, 1  ;;  %v1690_v24 = vperm.slane %v290_v17, 2  ;;  %v1692_v25 = vperm.slane %v290_v17, 3 }
  0x59   : > { %1044 = vmatmul.msk.bf16.gmra.mxu0 %vm340_vm0, %v1201_v14 }
  0x5a   : > { %1048 = vmatmul.msk.bf16.gmra.mxu1 %vm340_vm0, %v1201_v14 }
  0x5b   : > { %1052 = vmatmul.msk.bf16.gmra.mxu2 %vm340_vm0, %v1201_v14 }
  0x5c   : > { %1056 = vmatmul.msk.bf16.gmra.mxu3 %vm340_vm0, %v1201_v14 }
  0x69   : > { %1045 = vmatmul.msk.bf16.gmra.mxu0 %vm340_vm0, %v1202_v15 }
  0x6a   : > { %1049 = vmatmul.msk.bf16.gmra.mxu1 %vm340_vm0, %v1202_v15 }
  0x6b   : > { %1053 = vmatmul.msk.bf16.gmra.mxu2 %vm340_vm0, %v1202_v15 }
  0x6c   : > { %1057 = vmatmul.msk.bf16.gmra.mxu3 %vm340_vm0, %v1202_v15 }
  0x79   : > { %1046 = vmatmul.msk.bf16.gmra.mxu0 %vm340_vm0, %v1203_v16 }
  0x7a   : > { %1050 = vmatmul.msk.bf16.gmra.mxu1 %vm340_vm0, %v1203_v16 }
  0x7b   : > { %1054 = vmatmul.msk.bf16.gmra.mxu2 %vm340_vm0, %v1203_v16 }
  0x7c   : > { %1058 = vmatmul.msk.bf16.gmra.mxu3 %vm340_vm0, %v1203_v16 }
  0xc6   : > { %v362_v20 = vpop.f32.mrf.mxu0 }
  0xc7   : > { %v363_v21 = vadd.f32 %v362_v20, %v1684_v18  ;;  %v391_v22 = vpop.f32.mrf.mxu1 }
  0xc8   : > { %v392_v23 = vadd.f32 %v391_v22, %v1686_v19 }
  0xc9   : > { %469 = vst [vmem:[#allocation2] sm:$0xff] %v363_v21 }
  0xca   : > { %470 = vst [vmem:[#allocation2 + $0x8] sm:$0xff] %v392_v23 }
  0xce   : > { %v420_v26 = vpop.f32.mrf.mxu2  ;;  %v364_v29 = vpop.f32.mrf.mxu0 }
  0xcf   : > { %v421_v27 = vadd.f32 %v420_v26, %v1690_v24  ;;  %v449_v28 = vpop.f32.mrf.mxu3  ;;  %v365_v31 = vadd.f32 %v364_v29, %v1684_v18  ;;  %v393_v32 = vpop.f32.mrf.mxu1 }
  0xd0   : > { %v450_v30 = vadd.f32 %v449_v28, %v1692_v25  ;;  %v394_v33 = vadd.f32 %v393_v32, %v1686_v19 }
  0xd1   : > { %471 = vst [vmem:[#allocation2 + $0x10] sm:$0xff] %v421_v27 }
  0xd2   : > { %472 = vst [vmem:[#allocation2 + $0x18] sm:$0xff] %v450_v30 }
  0xd3   : > { %473 = vst [vmem:[#allocation2 + $0x20] sm:$0xff] %v365_v31 }
  0xd4   : > { %474 = vst [vmem:[#allocation2 + $0x28] sm:$0xff] %v394_v33 }
  0xd6   : > { %v422_v34 = vpop.f32.mrf.mxu2  ;;  %v367_v37 = vpop.f32.mrf.mxu0 }
  0xd7   : > { %v423_v35 = vadd.f32 %v422_v34, %v1690_v24  ;;  %v451_v36 = vpop.f32.mrf.mxu3  ;;  %v368_v39 = vadd.f32 %v367_v37, %v1684_v18  ;;  %v396_v40 = vpop.f32.mrf.mxu1 }
  0xd8   : > { %v452_v38 = vadd.f32 %v451_v36, %v1692_v25  ;;  %v397_v41 = vadd.f32 %v396_v40, %v1686_v19 }
  0xd9   : > { %475 = vst [vmem:[#allocation2 + $0x30] sm:$0xff] %v423_v35 }
  0xda   : > { %476 = vst [vmem:[#allocation2 + $0x38] sm:$0xff] %v452_v38 }
  0xdb   : > { %477 = vst [vmem:[#allocation2 + $0x40] sm:$0xff] %v368_v39 }
  0xdc   : > { %478 = vst [vmem:[#allocation2 + $0x48] sm:$0xff] %v397_v41 }
  0xde   : > { %v425_v42 = vpop.f32.mrf.mxu2  ;;  %v369_v45 = vpop.f32.mrf.mxu0 }
  0xdf   : > { %v426_v43 = vadd.f32 %v425_v42, %v1690_v24  ;;  %v454_v44 = vpop.f32.mrf.mxu3  ;;  %v370_v47 = vadd.f32 %v369_v45, %v1684_v18  ;;  %v398_v48 = vpop.f32.mrf.mxu1 }
  0xe0   : > { %v455_v46 = vadd.f32 %v454_v44, %v1692_v25  ;;  %v399_v49 = vadd.f32 %v398_v48, %v1686_v19 }
  0xe1   : > { %479 = vst [vmem:[#allocation2 + $0x50] sm:$0xff] %v426_v43 }
  0xe2   : > { %480 = vst [vmem:[#allocation2 + $0x58] sm:$0xff] %v455_v46 }
  0xe3   : > { %481 = vst [vmem:[#allocation2 + $0x60] sm:$0xff] %v370_v47 }
  0xe4   : > { %482 = vst [vmem:[#allocation2 + $0x68] sm:$0xff] %v399_v49 }
  0xe6   : > { %v427_v50 = vpop.f32.mrf.mxu2  ;;  %v372_v53 = vpop.f32.mrf.mxu0 }
  0xe7   : > { %v428_v51 = vadd.f32 %v427_v50, %v1690_v24  ;;  %v456_v52 = vpop.f32.mrf.mxu3  ;;  %v373_v55 = vadd.f32 %v372_v53, %v1684_v18  ;;  %v401_v56 = vpop.f32.mrf.mxu1 }
  0xe8   : > { %v457_v54 = vadd.f32 %v456_v52, %v1692_v25  ;;  %v402_v57 = vadd.f32 %v401_v56, %v1686_v19 }
  0xe9   : > { %483 = vst [vmem:[#allocation2 + $0x70] sm:$0xff] %v428_v51 }
  0xea   : > { %484 = vst [vmem:[#allocation2 + $0x78] sm:$0xff] %v457_v54 }
  0xeb   : > { %485 = vst [vmem:[#allocation2 + $0x80] sm:$0xff] %v373_v55 }
  0xec   : > { %486 = vst [vmem:[#allocation2 + $0x88] sm:$0xff] %v402_v57 }
  0xee   : > { %v430_v58 = vpop.f32.mrf.mxu2  ;;  %v374_v61 = vpop.f32.mrf.mxu0 }
  0xef   : > { %v431_v59 = vadd.f32 %v430_v58, %v1690_v24  ;;  %v459_v60 = vpop.f32.mrf.mxu3  ;;  %v375_v63 = vadd.f32 %v374_v61, %v1684_v18  ;;  %v403_v0 = vpop.f32.mrf.mxu1 }
  0xf0   : > { %v460_v62 = vadd.f32 %v459_v60, %v1692_v25  ;;  %v404_v1 = vadd.f32 %v403_v0, %v1686_v19 }
  0xf1   : > { %487 = vst [vmem:[#allocation2 + $0x90] sm:$0xff] %v431_v59 }
  0xf2   : > { %488 = vst [vmem:[#allocation2 + $0x98] sm:$0xff] %v460_v62 }
  0xf3   : > { %489 = vst [vmem:[#allocation2 + $0xa0] sm:$0xff] %v375_v63 }
  0xf4   : > { %490 = vst [vmem:[#allocation2 + $0xa8] sm:$0xff] %v404_v1 }
  0xf6   : > { %v432_v2 = vpop.f32.mrf.mxu2  ;;  %v377_v5 = vpop.f32.mrf.mxu0 }
  0xf7   : > { %v433_v3 = vadd.f32 %v432_v2, %v1690_v24  ;;  %v461_v4 = vpop.f32.mrf.mxu3  ;;  %v378_v7 = vadd.f32 %v377_v5, %v1684_v18  ;;  %v406_v8 = vpop.f32.mrf.mxu1 }
  0xf8   : > { %v462_v6 = vadd.f32 %v461_v4, %v1692_v25  ;;  %v407_v9 = vadd.f32 %v406_v8, %v1686_v19 }
  0xf9   : > { %491 = vst [vmem:[#allocation2 + $0xb0] sm:$0xff] %v433_v3 }
  0xfa   : > { %492 = vst [vmem:[#allocation2 + $0xb8] sm:$0xff] %v462_v6 }
  0xfb   : > { %493 = vst [vmem:[#allocation2 + $0xc0] sm:$0xff] %v378_v7 }
  0xfc   : > { %494 = vst [vmem:[#allocation2 + $0xc8] sm:$0xff] %v407_v9 }
  0xfe   : > { %v435_v10 = vpop.f32.mrf.mxu2  ;;  %v379_v13 = vpop.f32.mrf.mxu0 }
  0xff   : > { %v436_v11 = vadd.f32 %v435_v10, %v1690_v24  ;;  %v464_v12 = vpop.f32.mrf.mxu3  ;;  %v380_v15 = vadd.f32 %v379_v13, %v1684_v18  ;;  %v408_v16 = vpop.f32.mrf.mxu1 }
 0x100   : > { %v465_v14 = vadd.f32 %v464_v12, %v1692_v25  ;;  %v409_v17 = vadd.f32 %v408_v16, %v1686_v19 }
 0x101   : > { %495 = vst [vmem:[#allocation2 + $0xd0] sm:$0xff] %v436_v11 }
 0x102   : > { %496 = vst [vmem:[#allocation2 + $0xd8] sm:$0xff] %v465_v14 }
 0x103   : > { %497 = vst [vmem:[#allocation2 + $0xe0] sm:$0xff] %v380_v15 }
 0x104   : > { %498 = vst [vmem:[#allocation2 + $0xe8] sm:$0xff] %v409_v17 }
 0x106   : > { %v437_v20 = vpop.f32.mrf.mxu2 }
 0x107   : > { %v438_v21 = vadd.f32 %v437_v20, %v1690_v24  ;;  %v466_v22 = vpop.f32.mrf.mxu3 }
 0x108   : > { %v467_v23 = vadd.f32 %v466_v22, %v1692_v25 }
 0x109   : > { %499 = vst [vmem:[#allocation2 + $0xf0] sm:$0xff] %v438_v21 }
 0x10a   : > { %500 = vst [vmem:[#allocation2 + $0xf8] sm:$0xff] %v467_v23 }
 0x10b LB: >> { %v1176_v18 = vld [vmem:[%s1645_s12 + $0xe0] sm:$0xf]  ;;  %v1239_v19 = vld [vmem:[%s1645_s12 + $0xec] sm:$0xf0]  ;;  %v1237_v24 = vld [vmem:[%s1645_s12 + $0xe4] sm:$0xf]  ;;  %s1483_s17 = sphi %s1728_s17, %s508_s17  }
 0x10c   : >> { %v1177_v25 = vor.u32 %v1239_v19, %v1176_v18  ;;  %v1178_v26 = vld [vmem:[%s1645_s12 + $0xf0] sm:$0xf0]  ;;  %v1238_v27 = vld [vmem:[%s1645_s12 + $0xec] sm:$0xf]  ;;  %v1186_v28 = vld [vmem:[%s1645_s12 + $0xf8] sm:$0xf0] }
 0x10d   : >> { %v1181_v29 = vor.u32 %v1237_v24, %v1178_v26  ;;  %v1189_v30 = vor.u32 %v1238_v27, %v1186_v28  ;;  %v1160_v31 = vld [vmem:[%s1645_s12 + $0xc0] sm:$0xf]  ;;  %v1235_v32 = vld [vmem:[%s1645_s12 + $0xcc] sm:$0xf0]  ;;  %v1233_v33 = vld [vmem:[%s1645_s12 + $0xc4] sm:$0xf] }
 0x10e   : >> { %716 = vmatpush.bf16.msra.mxu0 %v1177_v25  ;;  %v1161_v34 = vor.u32 %v1235_v32, %v1160_v31  ;;  %v1162_v35 = vld [vmem:[%s1645_s12 + $0xd0] sm:$0xf0]  ;;  %v1234_v36 = vld [vmem:[%s1645_s12 + $0xcc] sm:$0xf]  ;;  %v1170_v37 = vld [vmem:[%s1645_s12 + $0xd8] sm:$0xf0] }
 0x10f   : >> { %729 = vmatpush.bf16.msra.mxu1 %v1181_v29  ;;  %755 = vmatpush.bf16.msra.mxu3 %v1189_v30  ;;  %v1165_v38 = vor.u32 %v1233_v33, %v1162_v35  ;;  %v1173_v39 = vor.u32 %v1234_v36, %v1170_v37  ;;  %v1184_v40 = vld [vmem:[%s1645_s12 + $0xe8] sm:$0xf]  ;;  %v1240_v41 = vld [vmem:[%s1645_s12 + $0xf4] sm:$0xf0]  ;;  %v1144_v42 = vld [vmem:[%s1645_s12 + $0xa0] sm:$0xf] }
 0x110   : >> { %v1185_v43 = vor.u32 %v1240_v41, %v1184_v40  ;;  %v1231_v44 = vld [vmem:[%s1645_s12 + $0xac] sm:$0xf0]  ;;  %v1229_v45 = vld [vmem:[%s1645_s12 + $0xa4] sm:$0xf]  ;;  %v1146_v46 = vld [vmem:[%s1645_s12 + $0xb0] sm:$0xf0] }
 0x111   : >> { %v1230_v47 = vld [vmem:[%s1645_s12 + $0xac] sm:$0xf]  ;;  %v1154_v48 = vld [vmem:[%s1645_s12 + $0xb8] sm:$0xf0]  ;;  %v1168_v49 = vld [vmem:[%s1645_s12 + $0xc8] sm:$0xf]  ;;  %v1145_v50 = vor.u32 %v1231_v44, %v1144_v42  ;;  %v1149_v54 = vor.u32 %v1229_v45, %v1146_v46 }
 0x112   : >> { %717 = vmatpush.bf16.msra.mxu0 %v1161_v34  ;;  %742 = vmatpush.bf16.msra.mxu2 %v1185_v43  ;;  %v1236_v51 = vld [vmem:[%s1645_s12 + $0xd4] sm:$0xf0]  ;;  %v1128_v52 = vld [vmem:[%s1645_s12 + $0x80] sm:$0xf]  ;;  %v1227_v53 = vld [vmem:[%s1645_s12 + $0x8c] sm:$0xf0]  ;;  %v1157_v55 = vor.u32 %v1230_v47, %v1154_v48 }
 0x113   : >> { %730 = vmatpush.bf16.msra.mxu1 %v1165_v38  ;;  %756 = vmatpush.bf16.msra.mxu3 %v1173_v39  ;;  %v1169_v56 = vor.u32 %v1236_v51, %v1168_v49  ;;  %v1225_v57 = vld [vmem:[%s1645_s12 + $0x84] sm:$0xf]  ;;  %v1130_v58 = vld [vmem:[%s1645_s12 + $0x90] sm:$0xf0]  ;;  %v1226_v59 = vld [vmem:[%s1645_s12 + $0x8c] sm:$0xf]  ;;  %v1129_v63 = vor.u32 %v1227_v53, %v1128_v52 }
 0x114   : >> { %v1138_v60 = vld [vmem:[%s1645_s12 + $0x98] sm:$0xf0]  ;;  %v1152_v61 = vld [vmem:[%s1645_s12 + $0xa8] sm:$0xf]  ;;  %v1232_v62 = vld [vmem:[%s1645_s12 + $0xb4] sm:$0xf0]  ;;  %v1133_v3 = vor.u32 %v1225_v57, %v1130_v58 }
 0x115   : >> { %v1153_v0 = vor.u32 %v1232_v62, %v1152_v61  ;;  %v1112_v1 = vld [vmem:[%s1645_s12 + $0x60] sm:$0xf]  ;;  %v1223_v2 = vld [vmem:[%s1645_s12 + $0x6c] sm:$0xf0]  ;;  %v1141_v4 = vor.u32 %v1226_v59, %v1138_v60  ;;  %v1221_v5 = vld [vmem:[%s1645_s12 + $0x64] sm:$0xf] }
 0x116   : >> { %718 = vmatpush.bf16.msra.mxu0 %v1145_v50  ;;  %743 = vmatpush.bf16.msra.mxu2 %v1169_v56  ;;  %v1136_v6 = vld [vmem:[%s1645_s12 + $0x88] sm:$0xf]  ;;  %v1228_v7 = vld [vmem:[%s1645_s12 + $0x94] sm:$0xf0]  ;;  %v1114_v8 = vld [vmem:[%s1645_s12 + $0x70] sm:$0xf0]  ;;  %v1113_v11 = vor.u32 %v1223_v2, %v1112_v1 }
 0x117   : >> { %731 = vmatpush.bf16.msra.mxu1 %v1149_v54  ;;  %757 = vmatpush.bf16.msra.mxu3 %v1157_v55  ;;  %v1222_v9 = vld [vmem:[%s1645_s12 + $0x6c] sm:$0xf]  ;;  %v1122_v10 = vld [vmem:[%s1645_s12 + $0x78] sm:$0xf0]  ;;  %v1137_v12 = vor.u32 %v1228_v7, %v1136_v6  ;;  %v1096_v13 = vld [vmem:[%s1645_s12 + $0x40] sm:$0xf]  ;;  %v1117_v15 = vor.u32 %v1221_v5, %v1114_v8 }
 0x118   : >> { %v1219_v14 = vld [vmem:[%s1645_s12 + $0x4c] sm:$0xf0]  ;;  %v1125_v16 = vor.u32 %v1222_v9, %v1122_v10  ;;  %v1217_v17 = vld [vmem:[%s1645_s12 + $0x44] sm:$0xf]  ;;  %v1120_v20 = vld [vmem:[%s1645_s12 + $0x68] sm:$0xf] }
 0x119   : >> { %v1224_v21 = vld [vmem:[%s1645_s12 + $0x74] sm:$0xf0]  ;;  %v1098_v22 = vld [vmem:[%s1645_s12 + $0x50] sm:$0xf0]  ;;  %v1218_v23 = vld [vmem:[%s1645_s12 + $0x4c] sm:$0xf]  ;;  %v1097_v19 = vor.u32 %v1219_v14, %v1096_v13 }
 0x11a   : >> { %719 = vmatpush.bf16.msra.mxu0 %v1129_v63  ;;  %744 = vmatpush.bf16.msra.mxu2 %v1153_v0  ;;  %v1106_v18 = vld [vmem:[%s1645_s12 + $0x58] sm:$0xf0]  ;;  %v1121_v24 = vor.u32 %v1224_v21, %v1120_v20  ;;  %v1080_v25 = vld [vmem:[%s1645_s12 + $0x20] sm:$0xf]  ;;  %v1215_v26 = vld [vmem:[%s1645_s12 + $0x2c] sm:$0xf0]  ;;  %v1101_v27 = vor.u32 %v1217_v17, %v1098_v22 }
 0x11b   : >> { %732 = vmatpush.bf16.msra.mxu1 %v1133_v3  ;;  %758 = vmatpush.bf16.msra.mxu3 %v1141_v4  ;;  %v1109_v28 = vor.u32 %v1218_v23, %v1106_v18  ;;  %v1213_v29 = vld [vmem:[%s1645_s12 + $0x24] sm:$0xf]  ;;  %v1104_v30 = vld [vmem:[%s1645_s12 + $0x48] sm:$0xf]  ;;  %v1220_v31 = vld [vmem:[%s1645_s12 + $0x54] sm:$0xf0]  ;;  %v1081_v35 = vor.u32 %v1215_v26, %v1080_v25 }
 0x11c   : >> { %v1082_v32 = vld [vmem:[%s1645_s12 + $0x30] sm:$0xf0]  ;;  %v1214_v33 = vld [vmem:[%s1645_s12 + $0x2c] sm:$0xf]  ;;  %v1090_v34 = vld [vmem:[%s1645_s12 + $0x38] sm:$0xf0]  ;;  %v1105_v36 = vor.u32 %v1220_v31, %v1104_v30 }
 0x11d   : >> { %v1064_v37 = vld [vmem:[%s1645_s12] sm:$0xf]  ;;  %v1211_v38 = vld [vmem:[%s1645_s12 + $0xc] sm:$0xf0]  ;;  %v1085_v39 = vor.u32 %v1213_v29, %v1082_v32  ;;  %v1093_v40 = vor.u32 %v1214_v33, %v1090_v34  ;;  %v1209_v41 = vld [vmem:[%s1645_s12 + $0x4] sm:$0xf] }
 0x11e   : >> { %720 = vmatpush.bf16.msra.mxu0 %v1113_v11  ;;  %745 = vmatpush.bf16.msra.mxu2 %v1137_v12  ;;  %v1088_v42 = vld [vmem:[%s1645_s12 + $0x28] sm:$0xf]  ;;  %v1216_v43 = vld [vmem:[%s1645_s12 + $0x34] sm:$0xf0]  ;;  %v1066_v44 = vld [vmem:[%s1645_s12 + $0x10] sm:$0xf0]  ;;  %v1065_v47 = vor.u32 %v1211_v38, %v1064_v37 }
 0x11f   : >> { %733 = vmatpush.bf16.msra.mxu1 %v1117_v15  ;;  %759 = vmatpush.bf16.msra.mxu3 %v1125_v16  ;;  %v1210_v45 = vld [vmem:[%s1645_s12 + $0xc] sm:$0xf]  ;;  %v1074_v46 = vld [vmem:[%s1645_s12 + $0x18] sm:$0xf0]  ;;  %v522_v48 = vld [vmem:[#allocation4] sm:$0xff]  ;;  %v1089_v49 = vor.u32 %v1216_v43, %v1088_v42  ;;  %v1069_v50 = vor.u32 %v1209_v41, %v1066_v44  ;;  %s510_s10 = ssub.s32 7, %s1483_s17 }
 0x120   : >> { %v1077_v51 = vor.u32 %v1210_v45, %v1074_v46  ;;  %v1072_v52 = vld [vmem:[%s1645_s12 + $0x8] sm:$0xf]  ;;  %v1212_v53 = vld [vmem:[%s1645_s12 + $0x14] sm:$0xf0]  ;;  %v523_v54 = vpack.c.bf16 %v522_v48, %v522_v48  ;;  %p1866_p13 = scmp.eq.s32.totalorder %s1536_s19, 0 }
 0x121   : >> { %v1073_v55 = vor.u32 %v1212_v53, %v1072_v52  ;;  %v830_v37 = vld [vmem:[#allocation5] sm:$0xff] }
 0x122   : >> { %721 = vmatpush.bf16.msra.mxu0 %v1097_v19  ;;  %746 = vmatpush.bf16.msra.mxu2 %v1121_v24  ;;  %s1801_s1 = scalar_select %p1866_p13, %s1483_s17, %s510_s10 }
 0x123   : >> { %734 = vmatpush.bf16.msra.mxu1 %v1101_v27  ;;  %760 = vmatpush.bf16.msra.mxu3 %v1109_v28  ;;  %s508_s17 = sadd.s32 1, %s1483_s17  }
 0x124   : >> { %s1059_s24 = sshll.u32 %s1801_s1, 3  ;;  %p505_p3 = scmp.ge.s32.totalorder %s508_s17, 8  }
 0x125   : >> { %s513_s6 = sshra.s32 %s1059_s24, 3  ;;  %s838_s8 = scalar_lea.vmem [#allocation3], %s1059_s24 }
 0x126   : >> { %722 = vmatpush.bf16.msra.mxu0 %v1081_v35  ;;  %747 = vmatpush.bf16.msra.mxu2 %v1105_v36  ;;  %s1208_s7 = sshll.u32 %s513_s6, 5  ;;  %s1241_s23 = sshll.u32 (%p505_p3), %s1536_s19, 5 }
 0x127   : >> { %735 = vmatpush.bf16.msra.mxu1 %v1085_v39  ;;  %761 = vmatpush.bf16.msra.mxu3 %v1093_v40  ;;  %s517_s26 = scalar_lea.vmem [#allocation2], %s1208_s7  ;;  %s876_s5 = scalar_lea.hbm (%p505_p3), %s1853_s4, %s1241_s23 }
 0x128   : >> { %v518_v56 = vld [vmem:[%s517_s26] sm:$0xff]  ;;  %v519_v57 = vld [vmem:[%s517_s26 + $0x8] sm:$0xff]  ;;  %v521_v0 = vld [vmem:[%s517_s26 + $0x18] sm:$0xff]  ;;  %s877_s9 = sshll.u32 (%p505_p3), %s1726_s22, 4  ;;  %s879_s12 = sshll.u32 (%p505_p3), %s876_s5, 4  ;;  %s878_s9 = int_to_ptr.vmem [resolvable:$true] %s877_s9  ;;  %s880_s12 = int_to_ptr.hbm [resolvable:$true] %s879_s12 }
 0x129   : >> { %v520_v11 = vld [vmem:[%s517_s26 + $0x10] sm:$0xff]  ;;  %s865_s19 = scalar_lea.sflag (%p505_p3), [#allocation8], %s1633_s29  ;;  %s1419_s11 = sshra.s32 (%p505_p3), %s880_s12, 4  ;;  %s1420_s11 = int_to_ptr.hbm [resolvable:$true] %s1419_s11 }
 0x12a   : >> { %723 = vmatpush.bf16.msra.mxu0 %v1065_v47  ;;  %748 = vmatpush.bf16.msra.mxu2 %v1089_v49  ;;  %s1421_s13 = scalar_lea.hbm (%p505_p3), %s1420_s11, 32  ;;  %s1425_s17 = scalar_lea.hbm (%p505_p3), %s1853_s4, 64 }
 0x12b   : >> { %736 = vmatpush.bf16.msra.mxu1 %v1069_v50  ;;  %762 = vmatpush.bf16.msra.mxu3 %v1077_v51  ;;  %p1422_p10 = scmp.ne.s32.totalorder (%p505_p3), %s1420_s11, %s1421_s13  ;;  %p1426_p9 = scmp.lt.s32.totalorder (%p505_p3), %s1420_s11, %s1853_s4 }
 0x12c   : > { %p1427_p0 = scmp.lt.s32.totalorder (%p505_p3), %s1425_s17, %s1421_s13 }
 0x12d   : >> { %724 = vmatmul.bf16.vlgmr.msra.gmra.mxu0 %v523_v54  ;;  %p1423_p2 = pnand (%p505_p3), %p1422_p10, %p1567_p11 }
 0x12e   : >> { %737 = vmatmul.bf16.vlgmr.msra.gmra.mxu1 %v523_v54  ;;  %763 = vmatmul.bf16.vlgmr.msra.gmra.mxu3 %v523_v54  ;;  %p1428_p1 = por (%p505_p3), %p1427_p0, %p1426_p9 }
 0x12f   : >> { %749 = vmatpush.bf16.msra.mxu2 %v1073_v55  ;;  %p1424_p4 = pneg (%p505_p3), %p1423_p2 }
 0x131   : > { %p1429_p7 = pnand (%p505_p3), %p1428_p1, %p1424_p4 }
 0x132   : >> { %750 = vmatmul.bf16.vlgmr.msra.gmra.mxu2 %v523_v54 }
 0x1aa   : >> { %v725_v58 = vpop.f32.mrf.mxu0 }
 0x1ab   : >> { %v768_v59 = vadd.f32 %v725_v58, %v518_v56  ;;  %v738_v60 = vpop.f32.mrf.mxu1 }
 0x1ac   : >> { %v769_v61 = vadd.f32 %v738_v60, %v519_v57 }
 0x1ad   : >> { %v1190_v62 = vmul.f32 -1.442695, %v768_v59 }
 0x1ae   : >> { %v1191_v63 = vmul.f32 -1.442695, %v769_v61 }
 0x1af   : >> { %1329 = vpow2.f32 %v1190_v62 }
 0x1b0   : >> { %1331 = vpow2.f32 %v1191_v63 }
 0x1b1   : >> { %v764_v1 = vpop.f32.mrf.mxu3 }
 0x1b2   : >> { %v771_v2 = vadd.f32 %v764_v1, %v521_v0  ;;  %v727_v3 = vpop.f32.mrf.mxu0 }
 0x1b3   : >> { %v740_v4 = vpop.f32.mrf.mxu1 }
 0x1b4   : >> { %v1192_v5 = vmul.f32 -1.442695, %v771_v2 }
 0x1b5   : >> { %v1330_v6 = vpop.eup %1329  ;;  %v751_v7 = vpop.f32.mrf.mxu2 }
 0x1b6   : >> { %v1332_v8 = vpop.eup %1331  ;;  %v775_v9 = vadd.f32 1.0, %v1330_v6  ;;  %1333 = vpow2.f32 %v1192_v5  ;;  %v770_v14 = vadd.f32 %v751_v7, %v520_v11 }
 0x1b7   : >> { %v794_v10 = vadd.f32 1.0, %v1332_v8 }
 0x1b8   : >> { %1335 = vrcp.f32 %v775_v9  ;;  %v787_v19 = vand.u32 2147483648, %v775_v9  ;;  %v785_v26 = vand.u32 2147483647, %v775_v9  ;;  %vm781_vm3 = vweird.f32 %v775_v9 }
 0x1b9   : >> { %1337 = vrcp.f32 %v794_v10  ;;  %v766_v12 = vpop.f32.mrf.mxu3  ;;  %v806_v24 = vand.u32 2147483648, %v794_v10  ;;  %v804_v28 = vand.u32 2147483647, %v794_v10  ;;  %vm800_vm4 = vweird.f32 %v794_v10 }
 0x1ba   : >> { %v788_v33 = vor.u32 1.1754944e-38, %v787_v19  ;;  %vm786_vm7 = vcmp.eq.f32.partialorder %v785_v26, 8.507059e+37 }
 0x1bb   : >> { %v807_v35 = vor.u32 1.1754944e-38, %v806_v24  ;;  %vm805_vm8 = vcmp.eq.f32.partialorder %v804_v28, 8.507059e+37 }
 0x1bc   : >> { %v1334_v13 = vpop.eup %1333 }
 0x1bd   : >> { %v814_v15 = vadd.f32 1.0, %v1334_v13  ;;  %v753_v16 = vpop.f32.mrf.mxu2 }
 0x1be   : >> { %v1336_v17 = vpop.eup %1335 }
 0x1bf   : >> { %v1338_v20 = vpop.eup %1337  ;;  %v777_v21 = vmul.f32 %v1336_v17, %v775_v9  ;;  %1339 = vrcp.f32 %v814_v15  ;;  %vm782_vm1 = vweird.f32 %v1336_v17  ;;  %v826_v47 = vand.u32 2147483648, %v814_v15 }
 0x1c0   : >> { %v796_v22 = vmul.f32 %v1338_v20, %v794_v10  ;;  %1341 = vtanh.f32 %v770_v14  ;;  %vm801_vm2 = vweird.f32 %v1338_v20  ;;  %vm783_vm5 = vmor %vm781_vm3, %vm782_vm1  ;;  %vm820_vm10 = vweird.f32 %v814_v15 }
 0x1c1   : >> { %v778_v23 = vsub.f32 1.0, %v777_v21  ;;  %vm802_vm6 = vmor %vm800_vm4, %vm801_vm2  ;;  %v824_v48 = vand.u32 2147483647, %v814_v15  ;;  %v827_v50 = vor.u32 1.1754944e-38, %v826_v47 }
 0x1c2   : >> { %v797_v18 = vsub.f32 1.0, %v796_v22 }
 0x1c3   : >> { %v779_v25 = vmul.f32 %v1336_v17, %v778_v23  ;;  %vm825_vm12 = vcmp.eq.f32.partialorder %v824_v48, 8.507059e+37 }
 0x1c4   : >> { %v798_v27 = vmul.f32 %v1338_v20, %v797_v18 }
 0x1c5   : >> { %v1340_v29 = vpop.eup %1339  ;;  %v780_v30 = vadd.f32 %v1336_v17, %v779_v25 }
 0x1c6   : >> { %v1342_v31 = vpop.eup %1341  ;;  %v816_v32 = vmul.f32 %v1340_v29, %v814_v15  ;;  %v799_v34 = vadd.f32 %v1338_v20, %v798_v27  ;;  %vm821_vm9 = vweird.f32 %v1340_v29 }
 0x1c7   : >> { %v784_v36 = vsel %vm783_vm5, %v1336_v17, %v780_v30  ;;  %vm822_vm11 = vmor %vm820_vm10, %vm821_vm9 }
 0x1c8   : >> { %v817_v38 = vsub.f32 1.0, %v816_v32  ;;  %v789_v39 = vsel %vm786_vm7, %v788_v33, %v784_v36  ;;  %v803_v40 = vsel %vm802_vm6, %v1338_v20, %v799_v34 }
 0x1c9   : >> { %v808_v41 = vsel %vm805_vm8, %v807_v35, %v803_v40  ;;  %v832_v42 = vmul.f32 %v1342_v31, %v789_v39 }
 0x1ca   : >> { %v818_v43 = vmul.f32 %v1340_v29, %v817_v38  ;;  %v831_v44 = vmul.f32 %v830_v37, %v808_v41 }
 0x1cc   : >> { %v833_v45 = vadd.f32 %v832_v42, %v831_v44  ;;  %v819_v46 = vadd.f32 %v1340_v29, %v818_v43 }
 0x1ce   : >> { %1343 = vtanh.f32 %v833_v45  ;;  %836 = vst [vmem:[#allocation5] sm:$0xff] %v833_v45  ;;  %v823_v49 = vsel %vm822_vm11, %v1340_v29, %v819_v46 }
 0x1cf   : >> { %v828_v52 = vsel %vm825_vm12, %v827_v50, %v823_v49 }
 0x1d4   : >> { %v1344_v51 = vpop.eup %1343  ;;  %507 = sbr.rel (!%p505_p3) target bundleno = 267 (0x10b), region = 106 }
 0x1d5   : >> { %v835_v53 = vmul.f32 %v1344_v51, %v828_v52 }
 0x1d7   : >> { %837 = vst [vmem:[#allocation4] sm:$0xff] %v835_v53 }
 0x1d8   : >> { %839 = vst [vmem:[%s838_s8] sm:$0xff] %v835_v53 }
 0x1df   : > { %v840_v54 = vld [vmem:[#allocation3] sm:$0xff]  ;;  %v841_v55 = vld [vmem:[#allocation3 + $0x8] sm:$0xff]  ;;  %v842_v56 = vld [vmem:[#allocation3 + $0x10] sm:$0xff] }
 0x1e0   : > { %v1245_v57 = vpack.c.bf16 %v841_v55, %v840_v54  ;;  %v843_v58 = vld [vmem:[#allocation3 + $0x18] sm:$0xff]  ;;  %v844_v59 = vld [vmem:[#allocation3 + $0x20] sm:$0xff]  ;;  %v845_v60 = vld [vmem:[#allocation3 + $0x28] sm:$0xff] }
 0x1e1   : > { %v1250_v61 = vpack.c.bf16 %v843_v58, %v842_v56  ;;  %v1255_v62 = vpack.c.bf16 %v845_v60, %v844_v59  ;;  %v846_v63 = vld [vmem:[#allocation3 + $0x30] sm:$0xff]  ;;  %v847_v0 = vld [vmem:[#allocation3 + $0x38] sm:$0xff] }
 0x1e2   : > { %1246 = vst [vmem:[%s1726_s22] sm:$0xff] %v1245_v57   ;;  %v1260_v1 = vpack.c.bf16 %v847_v0, %v846_v63 }
 0x1e3   : > { %1262 = vst [vmem:[%s1726_s22 + $0x8] sm:$0xff] %v1250_v61  }
 0x1e4   : > { %1263 = vst [vmem:[%s1726_s22 + $0x10] sm:$0xff] %v1255_v62  }
 0x1e5   : > { %1264 = vst [vmem:[%s1726_s22 + $0x18] sm:$0xff] %v1260_v1  }
 0x1e6   : > { %1432 = shalt.err (!%p1429_p7)
}
 0x1e7   : > { %s1488_s29 = smov 64   ;;  %s1489_s22 = smov 4  }
 0x1e8   : > { %1269 = dma.vmem_to_hbm [thread:$0]  (%p1567_p11), %s878_s9, 512, %s880_s12, %s865_s19, %s1488_s29, %s1488_s29, %s1489_s22  }
 0x1e9 PF: > { %s894_s24 = sand.u32 1, %s1467_s15   ;;  %p1867_p8 = scmp.ge.s32.totalorder %s1479_s18, 2 }
 0x1ea   : > { %s895_s6 = scalar_lea.sflag [#allocation8], %s894_s24 }
 0x1eb   : > { %p1279_p5 = pnand %p1867_p8, %p1571_p12 }
 0x1ed   : > { %p1280_p6 = pneg %p1279_p5 }
 0x1ef   : > { %1462 = dma.done.wait (%p1280_p6), %s895_s6, 512  }
 0x1f0   : > { %1464 = vsyncadd (%p1280_p6), %s895_s6, 4294966784  ;;  %s1868_s7 = sld [smem:[#allocation15_spill]]  ;;  %p20_p13 = scmp.ge.s32.totalorder %s1540_s21, 4  }
 0x1f1   : > { %s1869_s17 = sld [smem:[#allocation16_spill]]  ;;  %s1870_s15 = smov %s1471_s16 }
 0x1f2   : > { %s1872_s18 = smov %s1540_s21  ;;  %22 = sbr.rel (!%p20_p13) target bundleno = 9 (0x9), region = 117 }
 0x1f6   : > { %s1871_s16 = smov %s1868_s7 }
 0x1f7   :  { %901 = vsyncpa [#allocation7], 1 }
 0x1f8   :  { %903 = vsyncpa [#allocation7 + $0x1], 1 }
 0x1f9   :  { %904 = vsyncpa [#allocation10], 1 }
 0x1fa   :  { %906 = vsyncpa [#allocation10 + $0x1], 1 }
 0x1fb   :  { %907 = vsyncpa [#allocation8], 1 }
 0x1fc   :  { %909 = vsyncpa [#allocation8 + $0x1], 1 }

</bundles_post_ra>
